<compile_context>
chip_gen: v7x
topology: tpu7x:2x2x1
jax: 0.10.0
libtpu: 0.0.40
codegen_flags: <defaults>
</compile_context>

<pallas_src>
import numpy as np

import jax
import jax.numpy as jnp
from jax import lax
from jax.experimental import pallas as pl
from jax.experimental.pallas import tpu as pltpu

EPS = 1e-5


def _make_kernel(N, Hout, Wout, conv1_taps, n_bufs):
    """Static-shape kernel factory (everything below is Python-static)."""
    Q = Hout + 2                     # rows per image in the halo row space
    R1 = N * Q                       # conv1 output rows (incl. halo/junk rows)
    R2 = N * Q - 2                   # conv2 output rows
    inv_cnt = 1.0 / float(N * Hout * Wout)

    def kernel(*refs):
        bufs = refs[:n_bufs]
        (w1s_ref, w2s_ref, bc1_ref, bc2_ref,
         g1_ref, b1_ref, g2_ref, b2_ref, sc_ref, out_ref) = refs[n_bufs:]

        # ---- conv1: 3 banded GEMMs over row-shifted, lane-folded input buffers ----
        acc1 = None
        for dy, (bi, oy) in enumerate(conv1_taps):
            part = jnp.dot(bufs[bi][oy:oy + R1, :], w1s_ref[dy],
                           preferred_element_type=jnp.float32)
            acc1 = part if acc1 is None else acc1 + part

        # rows with (row mod Q) in {0, Hout+1} are inter-image halo / junk rows
        row1 = lax.broadcasted_iota(jnp.int32, (R1, 1), 0) % Q
        valid1 = (row1 >= 1) & (row1 <= Hout)

        # ---- bn1: two-pass batch stats over valid rows, then ReLU.  bc1 reduces the
        # folded lane axis to per-channel sums and broadcasts them back across the
        # Wout blocks in one exact 0/1-matrix product.
        sum1 = jnp.sum(jnp.where(valid1, acc1, 0.0), axis=0, keepdims=True)
        mu1 = jnp.dot(sum1, bc1_ref[...], preferred_element_type=jnp.float32) * inv_cnt
        d1 = acc1 - mu1
        d1m = jnp.where(valid1, d1, 0.0)
        var1 = jnp.dot(jnp.sum(d1m * d1m, axis=0, keepdims=True), bc1_ref[...],
                       preferred_element_type=jnp.float32) * inv_cnt
        h1 = d1 * (lax.rsqrt(var1 + EPS) * g1_ref[...]) + b1_ref[...]
        # zeroed halo rows implement conv2's top/bottom zero padding per image
        h1 = jnp.where(valid1, jnp.maximum(h1, 0.0), 0.0)

        # ---- conv2: 3 banded GEMMs over row-shifted h1 (left/right zero padding is
        # encoded by omitted blocks in w2s, so no masks or lane shifts are needed) ----
        acc2 = None
        for dy in range(3):
            part = jnp.dot(h1[dy:dy + R2, :], w2s_ref[dy],
                           preferred_element_type=jnp.float32)
            acc2 = part if acc2 is None else acc2 + part

        row2 = lax.broadcasted_iota(jnp.int32, (R2, 1), 0) % Q
        valid2 = row2 < Hout

        # ---- bn2: two-pass batch stats over valid rows ----
        sum2 = jnp.sum(jnp.where(valid2, acc2, 0.0), axis=0, keepdims=True)
        mu2 = jnp.dot(sum2, bc2_ref[...], preferred_element_type=jnp.float32) * inv_cnt
        d2 = acc2 - mu2
        d2m = jnp.where(valid2, d2, 0.0)
        var2 = jnp.dot(jnp.sum(d2m * d2m, axis=0, keepdims=True), bc2_ref[...],
                       preferred_element_type=jnp.float32) * inv_cnt
        h2 = d2 * (lax.rsqrt(var2 + EPS) * g2_ref[...]) + b2_ref[...]

        # ---- residual add + ReLU; lane-dense store of the valid rows only ----
        for n in range(N):
            out_ref[n * Hout:(n + 1) * Hout, :] = jnp.maximum(
                h2[n * Q:n * Q + Hout, :] + sc_ref[n * Hout:(n + 1) * Hout, :], 0.0)

    return kernel


def reduced_block_forward(x_nchw, w1, w2, gamma1, beta1, gamma2, beta2, stride=1):
    """Pallas implementation of ReducedBlock.forward.  x_nchw: (N, Cin, H, W) f32."""
    N, Cin, H, W = x_nchw.shape
    Cmid, Cout = w1.shape[0], w2.shape[0]
    assert stride in (1, 2), "option-'A' shortcut hard-codes ::2 subsampling"
    Hout = (H + 2 - 3) // stride + 1
    Wout = (W + 2 - 3) // stride + 1
    Q = Hout + 2
    LF_in = (W + 2) * Cin            # folded lane width of the input buffers
    LF_mid = Wout * Cmid             # folded lane width of h1
    LF_out = Wout * Cout             # folded lane width of the output

    x = jnp.transpose(x_nchw, (0, 2, 3, 1)).astype(jnp.float32)       # NHWC
    x_pad = jnp.pad(x, ((0, 0), (1, 1), (1, 1), (0, 0)))

    def fold(rows4d):
        # (N, P, W+2, Cin) -> (N*Q + 2, (W+2)*Cin): per-image blocks padded to Q rows,
        # plus one global zero row above/below so row-shifted slices stay in bounds.
        p = rows4d.shape[1]
        blk = rows4d.reshape(N, p, LF_in)
        if p < Q:
            blk = jnp.pad(blk, ((0, 0), (0, Q - p), (0, 0)))
        return jnp.pad(blk.reshape(N * Q, LF_in), ((1, 1), (0, 0)))

    if stride == 2:
        # row-parity split: dy=0/2 read even rows (row shift 0/1), dy=1 reads odd rows
        bufs = [fold(x_pad[:, 0::2, :, :]), fold(x_pad[:, 1::2, :, :])]
        conv1_taps = ((0, 0), (1, 0), (0, 1))        # (buffer, row shift) for dy=0,1,2
    else:
        bufs = [fold(x_pad)]
        conv1_taps = ((0, 0), (0, 1), (0, 2))

    # 3x3 weights -> per-dy banded GEMM matrices (stride + column zero padding encoded)
    w1_k = jnp.transpose(w1, (2, 3, 1, 0)).astype(jnp.float32)        # (3,3,Cin,Cmid)
    w2_k = jnp.transpose(w2, (2, 3, 1, 0)).astype(jnp.float32)        # (3,3,Cmid,Cout)
    ind1 = np.zeros((3, W + 2, Wout), np.float32)
    ind2 = np.zeros((3, Wout, Wout), np.float32)
    for dx in range(3):
        for j in range(Wout):
            ind1[dx, stride * j + dx, j] = 1.0
            jb = j + dx - 1
            if 0 <= jb < Wout:
                ind2[dx, jb, j] = 1.0
    w1s = jnp.einsum('yxcm,xrj->yrcjm', w1_k, jnp.asarray(ind1)).reshape(3, LF_in, LF_mid)
    w2s = jnp.einsum('yxcm,xrj->yrcjm', w2_k, jnp.asarray(ind2)).reshape(3, LF_mid, LF_out)

    # exact 0/1 matrices: per-channel sum across the Wout lane blocks + broadcast back
    bc1 = jnp.asarray(np.kron(np.ones((Wout, Wout), np.float32),
                              np.eye(Cmid, dtype=np.float32)))
    bc2 = jnp.asarray(np.kron(np.ones((Wout, Wout), np.float32),
                              np.eye(Cout, dtype=np.float32)))

    # lane-folded BN affine params
    g1f = jnp.tile(gamma1.astype(jnp.float32), Wout).reshape(1, LF_mid)
    b1f = jnp.tile(beta1.astype(jnp.float32), Wout).reshape(1, LF_mid)
    g2f = jnp.tile(gamma2.astype(jnp.float32), Wout).reshape(1, LF_out)
    b2f = jnp.tile(beta2.astype(jnp.float32), Wout).reshape(1, LF_out)

    # shortcut, pre-folded lane-dense and kept f32-exact (option 'A' channel zero-pad)
    if stride != 1 or Cin != Cout:
        pc = (Cout - Cin) // 2
        sc = jnp.pad(x[:, ::2, ::2, :], ((0, 0), (0, 0), (0, 0), (pc, pc)))
    else:
        sc = x
    sc2d = sc.reshape(N * Hout, LF_out).astype(jnp.float32)

    kernel = _make_kernel(N, Hout, Wout, conv1_taps, len(bufs))
    vmem = pl.BlockSpec(memory_space=pltpu.MemorySpace.VMEM)
    out2d = pl.pallas_call(
        kernel,
        out_shape=jax.ShapeDtypeStruct((N * Hout, LF_out), jnp.float32),
        in_specs=[vmem] * (len(bufs) + 9),
        out_specs=vmem,
    )(*bufs, w1s, w2s, bc1, bc2, g1f, b1f, g2f, b2f, sc2d)

    out = out2d.reshape(N, Hout, Wout, Cout)
    return jnp.transpose(out, (0, 3, 1, 2))                           # back to NCHW


def reference_forward(x, w1, w2, stride):
    """Pure-JAX (XLA conv, f32) reference mirroring the PyTorch module semantics."""
    def bn(y):  # training-mode BatchNorm2d, gamma=1, beta=0
        mu = y.mean(axis=(0, 2, 3), keepdims=True)
        var = ((y - mu) ** 2).mean(axis=(0, 2, 3), keepdims=True)
        return (y - mu) / jnp.sqrt(var + EPS)

    dn = ('NCHW', 'OIHW', 'NCHW')
    o = lax.conv_general_dilated(x, w1, (stride, stride), ((1, 1), (1, 1)),
                                 dimension_numbers=dn,
                                 precision=lax.Precision.HIGHEST)
    o = jnp.maximum(bn(o), 0.0)
    o = lax.conv_general_dilated(o, w2, (1, 1), ((1, 1), (1, 1)),
                                 dimension_numbers=dn,
                                 precision=lax.Precision.HIGHEST)
    o = bn(o)
    Cin, Cout = x.shape[1], w2.shape[0]
    if stride != 1 or Cin != Cout:
        pc = (Cout - Cin) // 2
        sc = jnp.pad(x[:, :, ::2, ::2], ((0, 0), (pc, pc), (0, 0), (0, 0)))
    else:
        sc = x
    return jnp.maximum(o + sc, 0.0)


if __name__ == "__main__":
    key = jax.random.PRNGKey(0)
    k1, k2, k3, k4, k5 = jax.random.split(key, 5)

    N, Cin, H, W = 2, 4, 16, 16          # x: (2, 4, 16, 16) NCHW, like the PyTorch module
    Cmid, Cout, stride = 8, 8, 2         # in_planes=4, inter_planes=8, planes=8, stride=2

    x = jax.random.normal(k1, (N, Cin, H, W), jnp.float32)
    weight_1 = 0.2 * jax.random.normal(k2, (Cmid, Cin, 3, 3), jnp.float32)
    weight_2 = 0.2 * jax.random.normal(k3, (Cout, Cmid, 3, 3), jnp.float32)
    alpha_1 = jax.random.uniform(k4, (Cin,), jnp.float32, 0.5, 1.5)
    alpha_2 = jax.random.uniform(k5, (Cmid,), jnp.float32, 0.5, 1.5)

    # __init__ scaling: for i in range(in_planes): weight_1[i] *= alpha_1[i]
    w1 = weight_1.at[:Cin].multiply(alpha_1[:, None, None, None])
    #                  for i in range(inter_planes): weight_2[i] *= alpha_2[i]
    w2 = weight_2.at[:Cmid].multiply(alpha_2[:, None, None, None])

    # BatchNorm affine params (PyTorch default init: weight=1, bias=0)
    gamma1 = jnp.ones((Cmid,), jnp.float32)
    beta1 = jnp.zeros((Cmid,), jnp.float32)
    gamma2 = jnp.ones((Cout,), jnp.float32)
    beta2 = jnp.zeros((Cout,), jnp.float32)
    # TODO(synk): BatchNorm running-stat updates (training bookkeeping) are not emitted;
    # they do not affect the forward output.

    out = reduced_block_forward(x, w1, w2, gamma1, beta1, gamma2, beta2, stride=stride)
    out = jax.block_until_ready(out)

    ref = reference_forward(x, w1, w2, stride)
    assert out.shape == ref.shape == (N, Cout, H // 2, W // 2), (out.shape, ref.shape)
    max_err = float(jnp.max(jnp.abs(out - ref)))
    # MXU default-precision GEMMs may run reduced-precision passes; keep the previous
    # tolerance (with f32 operands the observed error is typically far smaller).
    assert max_err < 3e-2, f"mismatch vs reference: {max_err}"

    print("KERNEL_OK")
</pallas_src>

<mosaic_0001>
module attributes {stable_mosaic.version = 11 : i64} {
  func.func @kernel(%arg0: memref<22x72xf32, #tpu.memory_space<vmem>>, %arg1: memref<22x72xf32, #tpu.memory_space<vmem>>, %arg2: memref<3x72x64xf32, #tpu.memory_space<vmem>>, %arg3: memref<3x64x64xf32, #tpu.memory_space<vmem>>, %arg4: memref<64x64xf32, #tpu.memory_space<vmem>>, %arg5: memref<64x64xf32, #tpu.memory_space<vmem>>, %arg6: memref<1x64xf32, #tpu.memory_space<vmem>>, %arg7: memref<1x64xf32, #tpu.memory_space<vmem>>, %arg8: memref<1x64xf32, #tpu.memory_space<vmem>>, %arg9: memref<1x64xf32, #tpu.memory_space<vmem>>, %arg10: memref<16x64xf32, #tpu.memory_space<vmem>>, %arg11: memref<16x64xf32, #tpu.memory_space<vmem>>) attributes {dimension_semantics = [], scalar_prefetch = 0 : i64, scratch_operands = 0 : i64, tpu.core_type = #tpu.core_type<tc>} {
    %c0 = arith.constant 0 : index
    %c0_0 = arith.constant 0 : index
    %0 = vector.load %arg0[%c0, %c0_0] : memref<22x72xf32, #tpu.memory_space<vmem>>, vector<20x72xf32>
    %c0_1 = arith.constant 0 : index
    %c0_2 = arith.constant 0 : index
    %c0_3 = arith.constant 0 : index
    %1 = vector.load %arg2[%c0_1, %c0_2, %c0_3] : memref<3x72x64xf32, #tpu.memory_space<vmem>>, vector<1x72x64xf32>
    %2 = vector.shape_cast %1 : vector<1x72x64xf32> to vector<72x64xf32>
    %cst = arith.constant dense<0.000000e+00> : vector<20x64xf32>
    %3 = tpu.matmul %0, %2, %cst {dimension_numbers = #tpu.dot_dimension_numbers<[1], [0], [0], [1], [0, 0, 1, 1], [], []>} : vector<20x72xf32>, vector<72x64xf32>, vector<20x64xf32> -> vector<20x64xf32>
    %c0_4 = arith.constant 0 : index
    %c0_5 = arith.constant 0 : index
    %4 = vector.load %arg1[%c0_4, %c0_5] : memref<22x72xf32, #tpu.memory_space<vmem>>, vector<20x72xf32>
    %c1 = arith.constant 1 : index
    %c0_6 = arith.constant 0 : index
    %c0_7 = arith.constant 0 : index
    %5 = vector.load %arg2[%c1, %c0_6, %c0_7] : memref<3x72x64xf32, #tpu.memory_space<vmem>>, vector<1x72x64xf32>
    %6 = vector.shape_cast %5 : vector<1x72x64xf32> to vector<72x64xf32>
    %cst_8 = arith.constant dense<0.000000e+00> : vector<20x64xf32>
    %7 = tpu.matmul %4, %6, %cst_8 {dimension_numbers = #tpu.dot_dimension_numbers<[1], [0], [0], [1], [0, 0, 1, 1], [], []>} : vector<20x72xf32>, vector<72x64xf32>, vector<20x64xf32> -> vector<20x64xf32>
    %8 = arith.addf %3, %7 : vector<20x64xf32>
    %c1_9 = arith.constant 1 : index
    %c0_10 = arith.constant 0 : index
    %9 = vector.load %arg0[%c1_9, %c0_10] : memref<22x72xf32, #tpu.memory_space<vmem>>, vector<20x72xf32>
    %c2 = arith.constant 2 : index
    %c0_11 = arith.constant 0 : index
    %c0_12 = arith.constant 0 : index
    %10 = vector.load %arg2[%c2, %c0_11, %c0_12] : memref<3x72x64xf32, #tpu.memory_space<vmem>>, vector<1x72x64xf32>
    %11 = vector.shape_cast %10 : vector<1x72x64xf32> to vector<72x64xf32>
    %cst_13 = arith.constant dense<0.000000e+00> : vector<20x64xf32>
    %12 = tpu.matmul %9, %11, %cst_13 {dimension_numbers = #tpu.dot_dimension_numbers<[1], [0], [0], [1], [0, 0, 1, 1], [], []>} : vector<20x72xf32>, vector<72x64xf32>, vector<20x64xf32> -> vector<20x64xf32>
    %13 = arith.addf %8, %12 : vector<20x64xf32>
    %14 = tpu.iota {dimensions = array<i32: 0>} : vector<20x1xi32>
    %c10_i32 = arith.constant 10 : i32
    %c0_i32 = arith.constant 0 : i32
    %15 = arith.cmpi eq, %c10_i32, %c0_i32 : i32
    %c1_i32 = arith.constant 1 : i32
    %16 = arith.select %15, %c1_i32, %c10_i32 : i32
    %17 = vector.broadcast %16 : i32 to vector<20x1xi32>
    %18 = arith.remsi %14, %17 : vector<20x1xi32>
    %c0_i32_14 = arith.constant 0 : i32
    %19 = vector.broadcast %c0_i32_14 : i32 to vector<20x1xi32>
    %20 = arith.cmpi ne, %18, %19 : vector<20x1xi32>
    %c0_i32_15 = arith.constant 0 : i32
    %21 = vector.broadcast %c0_i32_15 : i32 to vector<20x1xi32>
    %22 = arith.cmpi slt, %18, %21 : vector<20x1xi32>
    %c0_i32_16 = arith.constant 0 : i32
    %23 = arith.cmpi slt, %16, %c0_i32_16 : i32
    %24 = vector.broadcast %23 : i1 to vector<20x1xi1>
    %25 = vector.broadcast %24 : vector<20x1xi1> to vector<20x1xi1>
    %26 = arith.xori %22, %25 : vector<20x1xi1>
    %27 = arith.andi %26, %20 : vector<20x1xi1>
    %28 = vector.broadcast %16 : i32 to vector<20x1xi32>
    %29 = arith.addi %18, %28 : vector<20x1xi32>
    %30 = arith.select %27, %29, %18 : vector<20x1xi1>, vector<20x1xi32>
    %c1_i32_17 = arith.constant 1 : i32
    %31 = vector.broadcast %c1_i32_17 : i32 to vector<20x1xi32>
    %32 = arith.cmpi sge, %30, %31 : vector<20x1xi32>
    %c8_i32 = arith.constant 8 : i32
    %33 = vector.broadcast %c8_i32 : i32 to vector<20x1xi32>
    %34 = arith.cmpi sle, %30, %33 : vector<20x1xi32>
    %35 = arith.andi %32, %34 : vector<20x1xi1>
    %cst_18 = arith.constant 0.000000e+00 : f32
    %36 = vector.shape_cast %35 : vector<20x1xi1> to vector<20x1xi1>
    %37 = vector.broadcast %36 : vector<20x1xi1> to vector<20x64xi1>
    %38 = vector.broadcast %cst_18 : f32 to vector<20x64xf32>
    %39 = arith.select %37, %13, %38 : vector<20x64xi1>, vector<20x64xf32>
    %cst_19 = arith.constant dense<0.000000e+00> : vector<64xf32>
    %40 = vector.multi_reduction <add>, %39, %cst_19 [0] : vector<20x64xf32> to vector<64xf32>
    %41 = vector.shape_cast %40 : vector<64xf32> to vector<1x64xf32>
    %c0_20 = arith.constant 0 : index
    %c0_21 = arith.constant 0 : index
    %42 = vector.load %arg4[%c0_20, %c0_21] : memref<64x64xf32, #tpu.memory_space<vmem>>, vector<64x64xf32>
    %cst_22 = arith.constant dense<0.000000e+00> : vector<1x64xf32>
    %43 = tpu.matmul %41, %42, %cst_22 {dimension_numbers = #tpu.dot_dimension_numbers<[1], [0], [0], [1], [0, 0, 1, 1], [], []>} : vector<1x64xf32>, vector<64x64xf32>, vector<1x64xf32> -> vector<1x64xf32>
    %cst_23 = arith.constant 7.812500e-03 : f32
    %44 = vector.broadcast %cst_23 : f32 to vector<1x64xf32>
    %45 = arith.mulf %43, %44 : vector<1x64xf32>
    %46 = vector.broadcast %45 : vector<1x64xf32> to vector<20x64xf32>
    %47 = arith.subf %13, %46 : vector<20x64xf32>
    %cst_24 = arith.constant 0.000000e+00 : f32
    %48 = vector.shape_cast %35 : vector<20x1xi1> to vector<20x1xi1>
    %49 = vector.broadcast %48 : vector<20x1xi1> to vector<20x64xi1>
    %50 = vector.broadcast %cst_24 : f32 to vector<20x64xf32>
    %51 = arith.select %49, %47, %50 : vector<20x64xi1>, vector<20x64xf32>
    %52 = arith.mulf %51, %51 : vector<20x64xf32>
    %cst_25 = arith.constant dense<0.000000e+00> : vector<64xf32>
    %53 = vector.multi_reduction <add>, %52, %cst_25 [0] : vector<20x64xf32> to vector<64xf32>
    %54 = vector.shape_cast %53 : vector<64xf32> to vector<1x64xf32>
    %c0_26 = arith.constant 0 : index
    %c0_27 = arith.constant 0 : index
    %55 = vector.load %arg4[%c0_26, %c0_27] : memref<64x64xf32, #tpu.memory_space<vmem>>, vector<64x64xf32>
    %cst_28 = arith.constant dense<0.000000e+00> : vector<1x64xf32>
    %56 = tpu.matmul %54, %55, %cst_28 {dimension_numbers = #tpu.dot_dimension_numbers<[1], [0], [0], [1], [0, 0, 1, 1], [], []>} : vector<1x64xf32>, vector<64x64xf32>, vector<1x64xf32> -> vector<1x64xf32>
    %cst_29 = arith.constant 7.812500e-03 : f32
    %57 = vector.broadcast %cst_29 : f32 to vector<1x64xf32>
    %58 = arith.mulf %56, %57 : vector<1x64xf32>
    %cst_30 = arith.constant 9.99999974E-6 : f32
    %59 = vector.broadcast %cst_30 : f32 to vector<1x64xf32>
    %60 = arith.addf %58, %59 : vector<1x64xf32>
    %61 = math.rsqrt %60 : vector<1x64xf32>
    %c0_31 = arith.constant 0 : index
    %c0_32 = arith.constant 0 : index
    %62 = vector.load %arg6[%c0_31, %c0_32] : memref<1x64xf32, #tpu.memory_space<vmem>>, vector<1x64xf32>
    %63 = arith.mulf %61, %62 : vector<1x64xf32>
    %64 = vector.broadcast %63 : vector<1x64xf32> to vector<20x64xf32>
    %65 = arith.mulf %47, %64 : vector<20x64xf32>
    %c0_33 = arith.constant 0 : index
    %c0_34 = arith.constant 0 : index
    %66 = vector.load %arg7[%c0_33, %c0_34] : memref<1x64xf32, #tpu.memory_space<vmem>>, vector<1x64xf32>
    %67 = vector.broadcast %66 : vector<1x64xf32> to vector<20x64xf32>
    %68 = arith.addf %65, %67 : vector<20x64xf32>
    %cst_35 = arith.constant 0.000000e+00 : f32
    %69 = vector.broadcast %cst_35 : f32 to vector<20x64xf32>
    %70 = arith.maximumf %68, %69 : vector<20x64xf32>
    %cst_36 = arith.constant 0.000000e+00 : f32
    %71 = vector.shape_cast %35 : vector<20x1xi1> to vector<20x1xi1>
    %72 = vector.broadcast %71 : vector<20x1xi1> to vector<20x64xi1>
    %73 = vector.broadcast %cst_36 : f32 to vector<20x64xf32>
    %74 = arith.select %72, %70, %73 : vector<20x64xi1>, vector<20x64xf32>
    %75 = vector.extract_strided_slice %74 {offsets = [0, 0], sizes = [18, 64], strides = [1, 1]} : vector<20x64xf32> to vector<18x64xf32>
    %c0_37 = arith.constant 0 : index
    %c0_38 = arith.constant 0 : index
    %c0_39 = arith.constant 0 : index
    %76 = vector.load %arg3[%c0_37, %c0_38, %c0_39] : memref<3x64x64xf32, #tpu.memory_space<vmem>>, vector<1x64x64xf32>
    %77 = vector.shape_cast %76 : vector<1x64x64xf32> to vector<64x64xf32>
    %cst_40 = arith.constant dense<0.000000e+00> : vector<18x64xf32>
    %78 = tpu.matmul %75, %77, %cst_40 {dimension_numbers = #tpu.dot_dimension_numbers<[1], [0], [0], [1], [0, 0, 1, 1], [], []>} : vector<18x64xf32>, vector<64x64xf32>, vector<18x64xf32> -> vector<18x64xf32>
    %79 = vector.extract_strided_slice %74 {offsets = [1, 0], sizes = [18, 64], strides = [1, 1]} : vector<20x64xf32> to vector<18x64xf32>
    %c1_41 = arith.constant 1 : index
    %c0_42 = arith.constant 0 : index
    %c0_43 = arith.constant 0 : index
    %80 = vector.load %arg3[%c1_41, %c0_42, %c0_43] : memref<3x64x64xf32, #tpu.memory_space<vmem>>, vector<1x64x64xf32>
    %81 = vector.shape_cast %80 : vector<1x64x64xf32> to vector<64x64xf32>
    %cst_44 = arith.constant dense<0.000000e+00> : vector<18x64xf32>
    %82 = tpu.matmul %79, %81, %cst_44 {dimension_numbers = #tpu.dot_dimension_numbers<[1], [0], [0], [1], [0, 0, 1, 1], [], []>} : vector<18x64xf32>, vector<64x64xf32>, vector<18x64xf32> -> vector<18x64xf32>
    %83 = arith.addf %78, %82 : vector<18x64xf32>
    %84 = vector.extract_strided_slice %74 {offsets = [2, 0], sizes = [18, 64], strides = [1, 1]} : vector<20x64xf32> to vector<18x64xf32>
    %c2_45 = arith.constant 2 : index
    %c0_46 = arith.constant 0 : index
    %c0_47 = arith.constant 0 : index
    %85 = vector.load %arg3[%c2_45, %c0_46, %c0_47] : memref<3x64x64xf32, #tpu.memory_space<vmem>>, vector<1x64x64xf32>
    %86 = vector.shape_cast %85 : vector<1x64x64xf32> to vector<64x64xf32>
    %cst_48 = arith.constant dense<0.000000e+00> : vector<18x64xf32>
    %87 = tpu.matmul %84, %86, %cst_48 {dimension_numbers = #tpu.dot_dimension_numbers<[1], [0], [0], [1], [0, 0, 1, 1], [], []>} : vector<18x64xf32>, vector<64x64xf32>, vector<18x64xf32> -> vector<18x64xf32>
    %88 = arith.addf %83, %87 : vector<18x64xf32>
    %89 = tpu.iota {dimensions = array<i32: 0>} : vector<18x1xi32>
    %c10_i32_49 = arith.constant 10 : i32
    %c0_i32_50 = arith.constant 0 : i32
    %90 = arith.cmpi eq, %c10_i32_49, %c0_i32_50 : i32
    %c1_i32_51 = arith.constant 1 : i32
    %91 = arith.select %90, %c1_i32_51, %c10_i32_49 : i32
    %92 = vector.broadcast %91 : i32 to vector<18x1xi32>
    %93 = arith.remsi %89, %92 : vector<18x1xi32>
    %c0_i32_52 = arith.constant 0 : i32
    %94 = vector.broadcast %c0_i32_52 : i32 to vector<18x1xi32>
    %95 = arith.cmpi ne, %93, %94 : vector<18x1xi32>
    %c0_i32_53 = arith.constant 0 : i32
    %96 = vector.broadcast %c0_i32_53 : i32 to vector<18x1xi32>
    %97 = arith.cmpi slt, %93, %96 : vector<18x1xi32>
    %c0_i32_54 = arith.constant 0 : i32
    %98 = arith.cmpi slt, %91, %c0_i32_54 : i32
    %99 = vector.broadcast %98 : i1 to vector<18x1xi1>
    %100 = vector.broadcast %99 : vector<18x1xi1> to vector<18x1xi1>
    %101 = arith.xori %97, %100 : vector<18x1xi1>
    %102 = arith.andi %101, %95 : vector<18x1xi1>
    %103 = vector.broadcast %91 : i32 to vector<18x1xi32>
    %104 = arith.addi %93, %103 : vector<18x1xi32>
    %105 = arith.select %102, %104, %93 : vector<18x1xi1>, vector<18x1xi32>
    %c8_i32_55 = arith.constant 8 : i32
    %106 = vector.broadcast %c8_i32_55 : i32 to vector<18x1xi32>
    %107 = arith.cmpi slt, %105, %106 : vector<18x1xi32>
    %cst_56 = arith.constant 0.000000e+00 : f32
    %108 = vector.shape_cast %107 : vector<18x1xi1> to vector<18x1xi1>
    %109 = vector.broadcast %108 : vector<18x1xi1> to vector<18x64xi1>
    %110 = vector.broadcast %cst_56 : f32 to vector<18x64xf32>
    %111 = arith.select %109, %88, %110 : vector<18x64xi1>, vector<18x64xf32>
    %cst_57 = arith.constant dense<0.000000e+00> : vector<64xf32>
    %112 = vector.multi_reduction <add>, %111, %cst_57 [0] : vector<18x64xf32> to vector<64xf32>
    %113 = vector.shape_cast %112 : vector<64xf32> to vector<1x64xf32>
    %c0_58 = arith.constant 0 : index
    %c0_59 = arith.constant 0 : index
    %114 = vector.load %arg5[%c0_58, %c0_59] : memref<64x64xf32, #tpu.memory_space<vmem>>, vector<64x64xf32>
    %cst_60 = arith.constant dense<0.000000e+00> : vector<1x64xf32>
    %115 = tpu.matmul %113, %114, %cst_60 {dimension_numbers = #tpu.dot_dimension_numbers<[1], [0], [0], [1], [0, 0, 1, 1], [], []>} : vector<1x64xf32>, vector<64x64xf32>, vector<1x64xf32> -> vector<1x64xf32>
    %cst_61 = arith.constant 7.812500e-03 : f32
    %116 = vector.broadcast %cst_61 : f32 to vector<1x64xf32>
    %117 = arith.mulf %115, %116 : vector<1x64xf32>
    %118 = vector.broadcast %117 : vector<1x64xf32> to vector<18x64xf32>
    %119 = arith.subf %88, %118 : vector<18x64xf32>
    %cst_62 = arith.constant 0.000000e+00 : f32
    %120 = vector.shape_cast %107 : vector<18x1xi1> to vector<18x1xi1>
    %121 = vector.broadcast %120 : vector<18x1xi1> to vector<18x64xi1>
    %122 = vector.broadcast %cst_62 : f32 to vector<18x64xf32>
    %123 = arith.select %121, %119, %122 : vector<18x64xi1>, vector<18x64xf32>
    %124 = arith.mulf %123, %123 : vector<18x64xf32>
    %cst_63 = arith.constant dense<0.000000e+00> : vector<64xf32>
    %125 = vector.multi_reduction <add>, %124, %cst_63 [0] : vector<18x64xf32> to vector<64xf32>
    %126 = vector.shape_cast %125 : vector<64xf32> to vector<1x64xf32>
    %c0_64 = arith.constant 0 : index
    %c0_65 = arith.constant 0 : index
    %127 = vector.load %arg5[%c0_64, %c0_65] : memref<64x64xf32, #tpu.memory_space<vmem>>, vector<64x64xf32>
    %cst_66 = arith.constant dense<0.000000e+00> : vector<1x64xf32>
    %128 = tpu.matmul %126, %127, %cst_66 {dimension_numbers = #tpu.dot_dimension_numbers<[1], [0], [0], [1], [0, 0, 1, 1], [], []>} : vector<1x64xf32>, vector<64x64xf32>, vector<1x64xf32> -> vector<1x64xf32>
    %cst_67 = arith.constant 7.812500e-03 : f32
    %129 = vector.broadcast %cst_67 : f32 to vector<1x64xf32>
    %130 = arith.mulf %128, %129 : vector<1x64xf32>
    %cst_68 = arith.constant 9.99999974E-6 : f32
    %131 = vector.broadcast %cst_68 : f32 to vector<1x64xf32>
    %132 = arith.addf %130, %131 : vector<1x64xf32>
    %133 = math.rsqrt %132 : vector<1x64xf32>
    %c0_69 = arith.constant 0 : index
    %c0_70 = arith.constant 0 : index
    %134 = vector.load %arg8[%c0_69, %c0_70] : memref<1x64xf32, #tpu.memory_space<vmem>>, vector<1x64xf32>
    %135 = arith.mulf %133, %134 : vector<1x64xf32>
    %136 = vector.broadcast %135 : vector<1x64xf32> to vector<18x64xf32>
    %137 = arith.mulf %119, %136 : vector<18x64xf32>
    %c0_71 = arith.constant 0 : index
    %c0_72 = arith.constant 0 : index
    %138 = vector.load %arg9[%c0_71, %c0_72] : memref<1x64xf32, #tpu.memory_space<vmem>>, vector<1x64xf32>
    %139 = vector.broadcast %138 : vector<1x64xf32> to vector<18x64xf32>
    %140 = arith.addf %137, %139 : vector<18x64xf32>
    %141 = vector.extract_strided_slice %140 {offsets = [0, 0], sizes = [8, 64], strides = [1, 1]} : vector<18x64xf32> to vector<8x64xf32>
    %c0_73 = arith.constant 0 : index
    %c0_74 = arith.constant 0 : index
    %142 = vector.load %arg10[%c0_73, %c0_74] : memref<16x64xf32, #tpu.memory_space<vmem>>, vector<8x64xf32>
    %143 = arith.addf %141, %142 : vector<8x64xf32>
    %cst_75 = arith.constant 0.000000e+00 : f32
    %144 = vector.broadcast %cst_75 : f32 to vector<8x64xf32>
    %145 = arith.maximumf %143, %144 : vector<8x64xf32>
    %c0_76 = arith.constant 0 : index
    %c0_77 = arith.constant 0 : index
    %146 = vector.load %arg11[%c0_76, %c0_77] : memref<16x64xf32, #tpu.memory_space<vmem>>, vector<8x64xf32>
    tpu.vector_store %arg11[%c0_76, %c0_77], %145 {strides = array<i32>} : memref<16x64xf32, #tpu.memory_space<vmem>>, vector<8x64xf32>,
    %147 = vector.extract_strided_slice %140 {offsets = [10, 0], sizes = [8, 64], strides = [1, 1]} : vector<18x64xf32> to vector<8x64xf32>
    %c8 = arith.constant 8 : index
    %c0_78 = arith.constant 0 : index
    %148 = vector.load %arg10[%c8, %c0_78] : memref<16x64xf32, #tpu.memory_space<vmem>>, vector<8x64xf32>
    %149 = arith.addf %147, %148 : vector<8x64xf32>
    %cst_79 = arith.constant 0.000000e+00 : f32
    %150 = vector.broadcast %cst_79 : f32 to vector<8x64xf32>
    %151 = arith.maximumf %149, %150 : vector<8x64xf32>
    %c8_80 = arith.constant 8 : index
    %c0_81 = arith.constant 0 : index
    %152 = vector.load %arg11[%c8_80, %c0_81] : memref<16x64xf32, #tpu.memory_space<vmem>>, vector<8x64xf32>
    tpu.vector_store %arg11[%c8_80, %c0_81], %151 {strides = array<i32>} : memref<16x64xf32, #tpu.memory_space<vmem>>, vector<8x64xf32>,
    return
  }
}

</mosaic_0001>

<bundles_post_ra>
// kernel: tpu_custom_call.1
= control target key start
LH: loop header
LB: loop body
LE: loop exit
PB: predicated region body
PF: predicated region fallthrough
CT: control target
= control target key end

     0   :  { %v1775_v3 = vmov 0.0|0.0   ;;  %vm1776_vm0 = vmmov 0   ;;  %v1777_v6 = vmov 0.0   ;;  %s2337_s0 = inlined_call_operand.vmem [shape: f32[22,72], index: 0, kind: input, shape index: {}]   ;;  %s2338_s1 = inlined_call_operand.vmem [shape: f32[22,72], index: 1, kind: input, shape index: {}]   ;;  %s2339_s2 = inlined_call_operand.vmem [shape: f32[3,72,64], index: 2, kind: input, shape index: {}]   ;;  %s2340_s3 = inlined_call_operand.vmem [shape: f32[3,64,64], index: 3, kind: input, shape index: {}]   ;;  %s2341_s4 = inlined_call_operand.vmem [shape: f32[64,64], index: 4, kind: input, shape index: {}]   ;;  %s2342_s5 = inlined_call_operand.vmem [shape: f32[64,64], index: 5, kind: input, shape index: {}]   ;;  %s2343_s6 = inlined_call_operand.vmem [shape: f32[1,64], index: 6, kind: input, shape index: {}]   ;;  %s2344_s7 = inlined_call_operand.vmem [shape: f32[1,64], index: 7, kind: input, shape index: {}]   ;;  %s2345_s8 = inlined_call_operand.vmem [shape: f32[1,64], index: 8, kind: input, shape index: {}]   ;;  %s2346_s9 = inlined_call_operand.vmem [shape: f32[1,64], index: 9, kind: input, shape index: {}]   ;;  %s2347_s10 = inlined_call_operand.vmem [shape: f32[16,64], index: 10, kind: input, shape index: {}]   ;;  %s2348_s11 = inlined_call_operand.hbm [shape: f32[16,64], index: 11, kind: output, shape index: {}]  }
   0x1   :  { %v1196_v0 = vld [vmem:[%s2339_s2 + $0x48] sm:$0xff]  ;;  %v1197_v1 = vld [vmem:[%s2339_s2 + $0x50] sm:$0xff]  ;;  %v1198_v2 = vld [vmem:[%s2339_s2 + $0x58] sm:$0xff]  ;;  %1591 = vmatprep.subr.bf16.mxu0 %v1775_v3  ;;  %1377 = vmatprep.mubr.msk.f32.mxu0 %vm1776_vm0, %v1777_v6 }
   0x2   :  { %v1592_v4 = vpack.c.bf16 %v1197_v1, %v1196_v0  ;;  %v1199_v5 = vld [vmem:[%s2339_s2 + $0x60] sm:$0xff]  ;;  %1627 = vmatprep.subr.bf16.mxu1 %v1775_v3  ;;  %1456 = vmatprep.mubr.msk.f32.mxu1 %vm1776_vm0, %v1777_v6  ;;  %v1200_v8 = vld [vmem:[%s2339_s2 + $0x68] sm:$0xff]  ;;  %v1201_v9 = vld [vmem:[%s2339_s2 + $0x70] sm:$0xff] }
   0x3   :  { %v1595_v7 = vpack.c.bf16 %v1199_v5, %v1198_v2  ;;  %v1598_v10 = vpack.c.bf16 %v1201_v9, %v1200_v8  ;;  %v1202_v11 = vld [vmem:[%s2339_s2 + $0x78] sm:$0xff]  ;;  %v1203_v12 = vld [vmem:[%s2339_s2 + $0x80] sm:$0xff] }
   0x4   :  { %1593 = vmatpush3.bf16.msra.mxu0 %v1592_v4  ;;  %v1601_v13 = vpack.c.bf16 %v1203_v12, %v1202_v11 }
   0x5   :  { %1594 = vmatprep.subr.bf16.mxu0 %v1775_v3 }
   0x8   :  { %1596 = vmatpush3.bf16.msra.mxu0 %v1595_v7 }
   0x9   :  { %1597 = vmatprep.subr.bf16.mxu0 %v1775_v3 }
   0xc   :  { %1599 = vmatpush3.bf16.msra.mxu0 %v1598_v10 }
   0xd   :  { %1600 = vmatprep.subr.bf16.mxu0 %v1775_v3 }
   0xe   :  { %16 = vsyncpa [#allocation3], 0  ;;  %v42_v14 = vld [vmem:[%s2339_s2] sm:$0xff]  ;;  %v43_v15 = vld [vmem:[%s2339_s2 + $0x8] sm:$0xff]  ;;  %vm64_vm1 = vcmask 588800   ;;  %v348_v62 = vlaneseq }
   0xf   :  { %v1204_v16 = vld [vmem:[%s2339_s2 + $0x88] sm:$0xff]  ;;  %v51_v17 = vld [vmem:[%s2338_s1] sm:$0xff]  ;;  %v1604_v18 = vpack.c.bf16 %v43_v15, %v42_v14  ;;  %v44_v19 = vld [vmem:[%s2339_s2 + $0x10] sm:$0xff] }
  0x10   :  { %1602 = vmatpush3.bf16.msra.mxu0 %v1601_v13  ;;  %v45_v20 = vld [vmem:[%s2339_s2 + $0x18] sm:$0xff]  ;;  %v52_v22 = vld [vmem:[%s2338_s1 + $0x8] sm:$0xff]  ;;  %v46_v23 = vld [vmem:[%s2339_s2 + $0x20] sm:$0xff]  ;;  %v2037_v63 = vshrl.u32 %v348_v62, 7 }
  0x11   :  { %1375 = vmatprep.subr.mxu0 %v1777_v6  ;;  %v1607_v21 = vpack.c.bf16 %v45_v20, %v44_v19  ;;  %v47_v24 = vld [vmem:[%s2339_s2 + $0x28] sm:$0xff]  ;;  %v53_v26 = vld [vmem:[%s2338_s1 + $0x10] sm:$0xf]  ;;  %v49_v28 = vld [vmem:[%s2339_s2 + $0x38] sm:$0xff] }
  0x12   :  { %v1610_v25 = vpack.c.bf16 %v47_v24, %v46_v23  ;;  %v48_v27 = vld [vmem:[%s2339_s2 + $0x30] sm:$0xff]  ;;  %v1212_v31 = vld [vmem:[%s2339_s2 + $0x98] sm:$0xff]  ;;  %v50_v32 = vld [vmem:[%s2339_s2 + $0x40] sm:$0xff]  ;;  %v350_v0 = vadd.s32 8, %v2037_v63  ;;  %v2041_v1 = vmul.u32.u64.low 3435973837, %v2037_v63  ;;  %v2042_v2 = vmul.u32.u64.high 3435973837, %v2037_v63, %v2041_v1 }
  0x13   :  { %v1613_v29 = vpack.c.bf16 %v49_v28, %v48_v27  ;;  %v1211_v30 = vld [vmem:[%s2339_s2 + $0x90] sm:$0xff]  ;;  %v39_v33 = vld [vmem:[%s2337_s0] sm:$0xff]  ;;  %v1214_v36 = vld [vmem:[%s2339_s2 + $0xa8] sm:$0xff]  ;;  %v351_v7 = vadd.s32 16, %v2037_v63 }
  0x14   :  { %1376 = vmatpush3.msra.mxu0 %v1204_v16  ;;  %v1616_v34 = vpack.c.bf16 %v1212_v31, %v1211_v30  ;;  %v1213_v35 = vld [vmem:[%s2339_s2 + $0xa0] sm:$0xff]  ;;  %v40_v38 = vld [vmem:[%s2337_s0 + $0x8] sm:$0xff]  ;;  %v1215_v39 = vld [vmem:[%s2339_s2 + $0xb0] sm:$0xff]  ;;  %v2044_v4 = vmul.u32.u64.low 3435973837, %v350_v0  ;;  %v2045_v5 = vmul.u32.u64.high 3435973837, %v350_v0, %v2044_v4  ;;  %v358_v10 = vshrl.u32 %v2042_v2, 3 }
  0x15   :  { %1603 = vmatprep.subr.bf16.mxu0 %v1775_v3  ;;  %1378 = vmatmul.mubr.msk.f32.vlgmr.msra.gmra.mrb[0].mxu0 %vm64_vm1, %v51_v17  ;;  %v1619_v37 = vpack.c.bf16 %v1214_v36, %v1213_v35  ;;  %v1216_v40 = vld [vmem:[%s2339_s2 + $0xb8] sm:$0xff]  ;;  %v41_v42 = vld [vmem:[%s2337_s0 + $0x10] sm:$0xf]  ;;  %v1217_v43 = vld [vmem:[%s2339_s2 + $0xc0] sm:$0xff]  ;;  %v2048_v8 = vmul.u32.u64.low 3435973837, %v351_v7  ;;  %v2049_v9 = vmul.u32.u64.high 3435973837, %v351_v7, %v2048_v8 }
  0x16   :  { %1605 = vmatpush3.bf16.msra.mxu0 %v1604_v18  ;;  %1380 = vmatprep.mubr.msk.f32.mxu0 %vm1776_vm0, %v1777_v6  ;;  %v1622_v41 = vpack.c.bf16 %v1216_v40, %v1215_v39  ;;  %v1218_v44 = vld [vmem:[%s2339_s2 + $0xc8] sm:$0xff]  ;;  %v1219_v46 = vld [vmem:[%s2339_s2 + $0xd0] sm:$0xff]  ;;  %v431_v50 = vld [vmem:[%s2341_s4] sm:$0xff]  ;;  %v369_v11 = vshrl.u32 %v2045_v5, 3  ;;  %v359_v12 = vmul.u32 10, %v358_v10 }
  0x17   :  { %1606 = vmatprep.subr.bf16.mxu0 %v1775_v3  ;;  %v1625_v45 = vpack.c.bf16 %v1218_v44, %v1217_v43  ;;  %v243_v47 = vld [vmem:[%s2337_s0 + $0x1] sm:$0xff]  ;;  %v244_v48 = vld [vmem:[%s2337_s0 + $0x9] sm:$0xff]  ;;  %v245_v49 = vld [vmem:[%s2337_s0 + $0x11] sm:$0xf]  ;;  %v380_v14 = vshrl.u32 %v2049_v9, 3 }
  0x18   :  { %v432_v51 = vld [vmem:[%s2341_s4 + $0x8] sm:$0xff]  ;;  %v433_v53 = vld [vmem:[%s2341_s4 + $0x10] sm:$0xff]  ;;  %v434_v54 = vld [vmem:[%s2341_s4 + $0x18] sm:$0xff]  ;;  %v370_v13 = vmul.u32 10, %v369_v11  ;;  %v360_v15 = vsub.s32 %v2037_v63, %v359_v12 }
  0x19   :  { %1381 = vmatmul.mubr.msk.f32.gmra.mrb[2].mxu0 %vm64_vm1, %v52_v22  ;;  %v2003_v52 = vpack.c.bf16 %v432_v51, %v431_v50  ;;  %v2013_v55 = vpack.c.bf16 %v434_v54, %v433_v53  ;;  %v435_v56 = vld [vmem:[%s2341_s4 + $0x20] sm:$0xff]  ;;  %v436_v57 = vld [vmem:[%s2341_s4 + $0x28] sm:$0xff]  ;;  %v437_v59 = vld [vmem:[%s2341_s4 + $0x30] sm:$0xff]  ;;  %v381_v17 = vmul.u32 10, %v380_v14 }
  0x1a   :  { %1608 = vmatpush3.bf16.msra.mxu0 %v1607_v21  ;;  %1383 = vmatprep.mubr.msk.f32.mxu0 %vm1776_vm0, %v1777_v6  ;;  %v2023_v58 = vpack.c.bf16 %v436_v57, %v435_v56  ;;  %v438_v60 = vld [vmem:[%s2341_s4 + $0x38] sm:$0xff]  ;;  %v371_v16 = vsub.s32 %v350_v0, %v370_v13  ;;  %vm385_vm2 = vcmp.ne.s32.totalorder %v360_v15, 0  ;;  %vm388_vm3 = vcmp.lt.s32.totalorder %v360_v15, 0  ;;  %v1226_v11 = vld [vmem:[%s2340_s3 + $0x40] sm:$0xff]  ;;  %v1227_v12 = vld [vmem:[%s2340_s3 + $0x48] sm:$0xff] }
  0x1b   :  { %1609 = vmatprep.subr.bf16.mxu0 %v1775_v3  ;;  %1629 = vmatpush3.bf16.msra.mxu1 %v2003_v52  ;;  %v2033_v61 = vpack.c.bf16 %v438_v60, %v437_v59  ;;  %v394_v18 = vadd.s32 10, %v360_v15  ;;  %v382_v19 = vsub.s32 %v351_v7, %v381_v17  ;;  %vm391_vm6 = vmand %vm388_vm3, %vm385_vm2  ;;  %vm418_vm2 = vcmask 523264   ;;  %v1228_v14 = vld [vmem:[%s2340_s3 + $0x50] sm:$0xff]  ;;  %v1230_v17 = vld [vmem:[%s2340_s3 + $0x60] sm:$0xff] }
  0x1c   :  { %1630 = vmatprep.subr.bf16.mxu1 %v1775_v3  ;;  %vm386_vm4 = vcmp.ne.s32.totalorder %v371_v16, 0  ;;  %vm389_vm5 = vcmp.lt.s32.totalorder %v371_v16, 0  ;;  %v395_v20 = vadd.s32 10, %v371_v16  ;;  %v1652_v13 = vpack.c.bf16 %v1227_v12, %v1226_v11  ;;  %v641_v28 = vld [vmem:[%s2340_s3 + $0x18] sm:$0xff]  ;;  %v1246_v12 = vld [vmem:[%s2340_s3 + $0xb0] sm:$0xff] }
  0x1d   :  { %1384 = vmatmul.mubr.msk.f32.gmra.mrb[4].mxu0 %vm64_vm1, %v53_v26  ;;  %vm392_vm7 = vmand %vm389_vm5, %vm386_vm4  ;;  %v2055_v21 = vsel %vm391_vm6, %v394_v18, %v360_v15  ;;  %vm387_vm8 = vcmp.ne.s32.totalorder %v382_v19, 0  ;;  %vm390_vm9 = vcmp.lt.s32.totalorder %v382_v19, 0  ;;  %v396_v23 = vadd.s32 10, %v382_v19  ;;  %v1229_v15 = vld [vmem:[%s2340_s3 + $0x58] sm:$0xff]  ;;  %v1231_v18 = vld [vmem:[%s2340_s3 + $0x68] sm:$0xff] }
  0x1e   :  { %1611 = vmatpush3.bf16.msra.mxu0 %v1610_v25  ;;  %1404 = vmatprep.mubr.msk.f32.mxu0 %vm1776_vm0, %v1777_v6  ;;  %v2057_v22 = vsel %vm392_vm7, %v395_v20, %v371_v16  ;;  %vm400_vm10 = vcmp.ge.s32.totalorder %v2055_v21, 1  ;;  %vm403_vm11 = vcmp.le.s32.totalorder %v2055_v21, 8  ;;  %vm393_vm12 = vmand %vm390_vm9, %vm387_vm8  ;;  %vm422_vm6 = vcmask 519168   ;;  %v1232_v20 = vld [vmem:[%s2340_s3 + $0x70] sm:$0xff] }
  0x1f   :  { %1612 = vmatprep.subr.bf16.mxu0 %v1775_v3  ;;  %1632 = vmatpush3.bf16.msra.mxu1 %v2013_v55  ;;  %vm401_vm13 = vcmp.ge.s32.totalorder %v2057_v22, 1  ;;  %vm404_vm14 = vcmp.le.s32.totalorder %v2057_v22, 8  ;;  %vm2063_vm15 = vmand %vm400_vm10, %vm403_vm11  ;;  %v2067_v26 = vsel %vm393_vm12, %v396_v23, %v382_v19  ;;  %v1655_v16 = vpack.c.bf16 %v1229_v15, %v1228_v14  ;;  %v1233_v23 = vld [vmem:[%s2340_s3 + $0x78] sm:$0xff]  ;;  %v640_v25 = vld [vmem:[%s2340_s3 + $0x10] sm:$0xff] }
  0x20   :  { %1633 = vmatprep.subr.bf16.mxu1 %v1775_v3  ;;  %vm402_vm3 = vcmp.ge.s32.totalorder %v2067_v26, 1  ;;  %vm405_vm4 = vcmp.le.s32.totalorder %v2067_v26, 8  ;;  %v1658_v19 = vpack.c.bf16 %v1231_v18, %v1230_v17  ;;  %vm658_vm7 = vcmask 1046528  }
  0x21   :  { %vm2081_vm5 = vmand %vm402_vm3, %vm405_vm4  ;;  %v1667_v35 = vpack.c.bf16 %v641_v28, %v640_v25  ;;  %vm845_vm8 = vcmask 1045504   ;;  %vm940_vm9 = vcmp.lt.s32.totalorder %v2055_v21, 8  ;;  %vm941_vm10 = vcmp.lt.s32.totalorder %v2057_v22, 8 }
  0x22   :  { %1614 = vmatpush3.bf16.msra.mxu0 %v1613_v29  ;;  %vm942_vm11 = vcmp.lt.s32.totalorder %v2067_v26, 8  ;;  %vm955_vm12 = vcmask 517120  }
  0x23   :  { %1402 = vmatprep.subr.mxu0 %v1777_v6  ;;  %1635 = vmatpush3.bf16.msra.mxu1 %v2023_v58 }
  0x24   :  { %1636 = vmatprep.subr.bf16.mxu1 %v1775_v3 }
  0x26   :  { %1403 = vmatpush3.msra.mxu0 %v50_v32 }
  0x27   :  { %1615 = vmatprep.subr.bf16.mxu0 %v1775_v3  ;;  %1405 = vmatmul.mubr.msk.f32.vlgmr.msra.gmra.mrb[0].mxu0 %vm64_vm1, %v39_v33 }
  0x28   :  { %1617 = vmatpush3.bf16.msra.mxu0 %v1616_v34  ;;  %1407 = vmatprep.mubr.msk.f32.mxu0 %vm1776_vm0, %v1777_v6 }
  0x29   :  { %1618 = vmatprep.subr.bf16.mxu0 %v1775_v3  ;;  %1638 = vmatpush3.bf16.msra.mxu1 %v2033_v61 }
  0x2a   :  { %1639 = vmatprep.subr.bf16.mxu1 %v1775_v3 }
  0x2b   :  { %1408 = vmatmul.mubr.msk.f32.gmra.mrb[2].mxu0 %vm64_vm1, %v40_v38 }
  0x2c   :  { %1620 = vmatpush3.bf16.msra.mxu0 %v1619_v37  ;;  %1410 = vmatprep.mubr.msk.f32.mxu0 %vm1776_vm0, %v1777_v6 }
  0x2d   :  { %1621 = vmatprep.subr.bf16.mxu0 %v1775_v3 }
  0x2f   :  { %1411 = vmatmul.mubr.msk.f32.gmra.mrb[4].mxu0 %vm64_vm1, %v41_v42 }
  0x30   :  { %1623 = vmatpush3.bf16.msra.mxu0 %v1622_v41  ;;  %1431 = vmatprep.mubr.msk.f32.mxu0 %vm1776_vm0, %v1777_v6 }
  0x31   :  { %1624 = vmatprep.subr.bf16.mxu0 %v1775_v3 }
  0x34   :  { %1626 = vmatpush3.bf16.msra.mxu0 %v1625_v45 }
  0x35   :  { %1429 = vmatprep.subr.mxu0 %v1777_v6 }
  0x38   :  { %1430 = vmatpush3.msra.mxu0 %v1219_v46 }
  0x39   :  { %1432 = vmatmul.mubr.msk.f32.vlgmr.msra.gmra.mrb[0].mxu0 %vm64_vm1, %v243_v47  ;;  %1687 = vmatprep.subr.bf16.mxu0 %v1775_v3 }
  0x3a   :  { %1434 = vmatprep.mubr.msk.f32.mxu0 %vm1776_vm0, %v1777_v6 }
  0x3d   :  { %1435 = vmatmul.mubr.msk.f32.gmra.mrb[2].mxu0 %vm64_vm1, %v244_v48  ;;  %v2100_v48 = vsub.s32 0, %v2037_v63 }
  0x3e   :  { %1437 = vmatprep.mubr.msk.f32.mxu0 %vm1776_vm0, %v1777_v6 }
  0x41   :  { %1438 = vmatmul.mubr.msk.f32.gmra.mrb[4].mxu0 %vm64_vm1, %v245_v49  ;;  %vm2069_vm1 = vmand %vm401_vm13, %vm404_vm14 }
  0x42   :  { %1569 = vmatprep.mubr.msk.f32.mxu0 %vm1776_vm0, %v1777_v6 }
 0x10c   :  { %v331_v24 = vpop.f32.mrb[0].mxu0 }
 0x10d   :  { %v1433_v27 = vpop.f32.mrb[1].mxu0  ;;  %v415_v29 = vsel %vm2063_vm15, %v331_v24, 0.0 }
 0x10e   :  { %v419_v33 = vsel %vm418_vm2, %v415_v29, 0.0 }
 0x110   :  { %v336_v30 = vpop.f32.mrb[2].mxu0 }
 0x111   :  { %v416_v31 = vsel %vm2069_vm1, %v336_v30, 0.0  ;;  %v1436_v32 = vpop.f32.mrb[3].mxu0 }
 0x112   :  { %v420_v34 = vsel %vm418_vm2, %v416_v31, 0.0  ;;  %v613_v32 = vld [vmem:[%s2343_s6] sm:$0x1] }
 0x113   :  { %v421_v36 = vadd.f32 %v420_v34, %v419_v33 }
 0x114   :  { %v341_v37 = vpop.f32.mrb[4].mxu0 }
 0x115   :  { %v417_v38 = vsel %vm2081_vm5, %v341_v37, 0.0  ;;  %v1439_v39 = vpop.f32.mrb[5].mxu0 }
 0x116   :  { %v423_v40 = vsel %vm422_vm6, %v417_v38, 0.0 }
 0x117   :  { %v424_v41 = vadd.f32 %v423_v40, %v421_v36 }
 0x119   :  { %v425_v42 = vrot.slane %v424_v41, 4 }
 0x11b   :  { %v426_v43 = vadd.f32 %v425_v42, %v424_v41 }
 0x11d   :  { %v427_v44 = vrot.slane %v426_v43, 2 }
 0x11f   :  { %v428_v45 = vadd.f32 %v427_v44, %v426_v43 }
 0x121   :  { %v429_v46 = vrot.slane %v428_v45, 1 }
 0x123   :  { %v430_v47 = vadd.f32 %v429_v46, %v428_v45  ;;  %v638_v46 = vld [vmem:[%s2340_s3] sm:$0xff] }
 0x125   :  { %1457 = vmatmul.mubr.msk.f32.vlgmr.msra.gmra.mrb[0].mxu1 %vm418_vm2, %v430_v47  ;;  %v639_v47 = vld [vmem:[%s2340_s3 + $0x8] sm:$0xff] }
 0x126   :  { %1641 = vmatpush3.bf16.msra.mxu1 %v2003_v52  ;;  %1475 = vmatprep.mubr.msk.f32.mxu1 %vm1776_vm0, %v1777_v6 }
 0x127   :  { %1642 = vmatprep.subr.bf16.mxu1 %v1775_v3 }
 0x12a   :  { %1644 = vmatpush3.bf16.msra.mxu1 %v2013_v55 }
 0x12b   :  { %1645 = vmatprep.subr.bf16.mxu1 %v1775_v3 }
 0x12e   :  { %1647 = vmatpush3.bf16.msra.mxu1 %v2023_v58 }
 0x12f   :  { %1648 = vmatprep.subr.bf16.mxu1 %v1775_v3 }
 0x132   :  { %1650 = vmatpush3.bf16.msra.mxu1 %v2033_v61 }
 0x133   :  { %1651 = vmatprep.subr.bf16.mxu1 %v1775_v3 }
 0x1f8   :  { %v508_v49 = vpop.f32.mrb[0].mxu1 }
 0x1f9   :  { %v512_v50 = vmul.f32 0.0078125, %v508_v49  ;;  %v1458_v51 = vpop.f32.mrb[1].mxu1 }
 0x1fb   :  { %v516_v52 = vrot.slane %v512_v50, %v2100_v48 }
 0x1fd   :  { %v517_v53 = vsub.f32 %v331_v24, %v516_v52  ;;  %v518_v54 = vsub.f32 %v336_v30, %v516_v52  ;;  %v519_v55 = vsub.f32 %v341_v37, %v516_v52  ;;  %v1661_v24 = vpack.c.bf16 %v1233_v23, %v1232_v20  ;;  %v1225_v37 = vld [vmem:[%s2344_s7] ss:$0 sm:$0xff]  ;;  %v965_v23 = vld [vmem:[%s2342_s5 + $0x8] sm:$0xff] }
 0x1fe   :  { %v964_v20 = vld [vmem:[%s2342_s5] sm:$0xff] }
 0x1ff   :  { %v520_v56 = vsel %vm2063_vm15, %v517_v53, 0.0  ;;  %v521_v57 = vsel %vm2069_vm1, %v518_v54, 0.0  ;;  %v522_v58 = vsel %vm2081_vm5, %v519_v55, 0.0 }
 0x200   :  { %v523_v59 = vmul.f32 %v520_v56, %v520_v56  ;;  %v524_v60 = vmul.f32 %v521_v57, %v521_v57  ;;  %v525_v61 = vmul.f32 %v522_v58, %v522_v58  ;;  %v642_v58 = vld [vmem:[%s2340_s3 + $0x20] sm:$0xff] }
 0x202   :  { %v526_v62 = vsel %vm418_vm2, %v523_v59, 0.0  ;;  %v527_v63 = vsel %vm418_vm2, %v524_v60, 0.0  ;;  %v529_v1 = vsel %vm422_vm6, %v525_v61, 0.0  ;;  %v643_v59 = vld [vmem:[%s2340_s3 + $0x28] sm:$0xff] }
 0x203   :  { %v528_v0 = vadd.f32 %v527_v63, %v526_v62  ;;  %v1670_v61 = vpack.c.bf16 %v643_v59, %v642_v58  ;;  %v644_v62 = vld [vmem:[%s2340_s3 + $0x30] sm:$0xff]  ;;  %v645_v63 = vld [vmem:[%s2340_s3 + $0x38] sm:$0xff] }
 0x205   :  { %v530_v2 = vadd.f32 %v529_v1, %v528_v0  ;;  %v1673_v0 = vpack.c.bf16 %v645_v63, %v644_v62  ;;  %v1240_v1 = vld [vmem:[%s2340_s3 + $0x80] sm:$0xff] }
 0x207   :  { %v531_v4 = vrot.slane %v530_v2, 4 }
 0x209   :  { %v532_v5 = vadd.f32 %v531_v4, %v530_v2  ;;  %v1241_v2 = vld [vmem:[%s2340_s3 + $0x88] sm:$0xff] }
 0x20a   :  { %v1676_v4 = vpack.c.bf16 %v1241_v2, %v1240_v1 }
 0x20b   :  { %v533_v7 = vrot.slane %v532_v5, 2 }
 0x20d   :  { %v534_v8 = vadd.f32 %v533_v7, %v532_v5  ;;  %v1242_v5 = vld [vmem:[%s2340_s3 + $0x90] sm:$0xff]  ;;  %v1243_v7 = vld [vmem:[%s2340_s3 + $0x98] sm:$0xff] }
 0x20f   :  { %v535_v9 = vrot.slane %v534_v8, 1 }
 0x211   :  { %v536_v10 = vadd.f32 %v535_v9, %v534_v8  ;;  %v1679_v8 = vpack.c.bf16 %v1243_v7, %v1242_v5  ;;  %v1244_v9 = vld [vmem:[%s2340_s3 + $0xa0] sm:$0xff] }
 0x213   :  { %1476 = vmatmul.mubr.msk.f32.vlgmr.msra.gmra.mrb[2].mxu1 %vm418_vm2, %v536_v10  ;;  %v1245_v10 = vld [vmem:[%s2340_s3 + $0xa8] sm:$0xff] }
 0x214   :  { %1494 = vmatprep.mubr.msk.f32.mxu1 %vm1776_vm0, %v1777_v6  ;;  %1653 = vmatpush3.bf16.msra.mxu1 %v1652_v13  ;;  %v1682_v11 = vpack.c.bf16 %v1245_v10, %v1244_v9  ;;  %v1247_v13 = vld [vmem:[%s2340_s3 + $0xb8] sm:$0xff] }
 0x215   :  { %1654 = vmatprep.subr.bf16.mxu1 %v1775_v3  ;;  %v1685_v14 = vpack.c.bf16 %v1247_v13, %v1246_v12 }
 0x218   :  { %1656 = vmatpush3.bf16.msra.mxu1 %v1655_v16 }
 0x219   :  { %1657 = vmatprep.subr.bf16.mxu1 %v1775_v3 }
 0x21c   :  { %1659 = vmatpush3.bf16.msra.mxu1 %v1658_v19 }
 0x21d   :  { %1660 = vmatprep.subr.bf16.mxu1 %v1775_v3 }
 0x220   :  { %1662 = vmatpush3.bf16.msra.mxu1 %v1661_v24  ;;  %v1688_v24 = vpack.c.bf16 %v965_v23, %v964_v20  ;;  %v1169_v20 = vld [vmem:[%s2347_s10 + $0x8] sm:$0xff] }
 0x221   :  { %1663 = vmatprep.subr.bf16.mxu1 %v1775_v3 }
 0x222   :  { %1689 = vmatpush3.bf16.msra.mxu0 %v1688_v24 }
 0x223   :  { %1690 = vmatprep.subr.bf16.mxu0 %v1775_v3 }
 0x2e6   :  { %v606_v27 = vpop.f32.mrb[2].mxu1 }
 0x2e7   :  { %v610_v29 = vmul.f32 0.0078125, %v606_v27  ;;  %v1477_v30 = vpop.f32.mrb[3].mxu1  ;;  %v966_v27 = vld [vmem:[%s2342_s5 + $0x10] sm:$0xff] }
 0x2e9   :  { %v611_v31 = vadd.f32 1e-05, %v610_v29  ;;  %v967_v29 = vld [vmem:[%s2342_s5 + $0x18] sm:$0xff] }
 0x2ea   :  { %v1691_v30 = vpack.c.bf16 %v967_v29, %v966_v27 }
 0x2eb   :  { %1747 = vrsqrt.f32 %v611_v31  ;;  %v968_v31 = vld [vmem:[%s2342_s5 + $0x20] sm:$0xff] }
 0x2ec   :  { %1692 = vmatpush3.bf16.msra.mxu0 %v1691_v30 }
 0x2ed   :  { %1693 = vmatprep.subr.bf16.mxu0 %v1775_v3 }
 0x2f5   :  { %v1748_v33 = vpop.eup %1747 }
 0x2f6   :  { %v614_v34 = vmul.f32 %v1748_v33, %v613_v32  ;;  %v969_v32 = vld [vmem:[%s2342_s5 + $0x28] sm:$0xff] }
 0x2f7   :  { %v1694_v33 = vpack.c.bf16 %v969_v32, %v968_v31  ;;  %v1171_v31 = vrot.slane %v1169_v20, 6  ;;  %v1165_v32 = vld [vmem:[%s2347_s10] sm:$0xff] }
 0x2f8   :  { %v618_v36 = vrot.slane %v614_v34, %v2100_v48  ;;  %v970_v34 = vld [vmem:[%s2342_s5 + $0x30] sm:$0xff] }
 0x2f9   :  { %1695 = vmatpush3.bf16.msra.mxu0 %v1694_v33 }
 0x2fa   :  { %v619_v38 = vmul.f32 %v618_v36, %v517_v53  ;;  %v620_v39 = vmul.f32 %v618_v36, %v518_v54  ;;  %v621_v40 = vmul.f32 %v618_v36, %v519_v55  ;;  %v1664_v55 = vpack.c.bf16 %v639_v47, %v638_v46  ;;  %1696 = vmatprep.subr.bf16.mxu0 %v1775_v3  ;;  %v971_v36 = vld [vmem:[%s2342_s5 + $0x38] sm:$0xff] }
 0x2fc   :  { %v629_v41 = vadd.f32 %v1225_v37, %v619_v38  ;;  %v630_v42 = vadd.f32 %v1225_v37, %v620_v39  ;;  %v631_v43 = vadd.f32 %v1225_v37, %v621_v40  ;;  %v1697_v37 = vpack.c.bf16 %v971_v36, %v970_v34 }
 0x2fe   :  { %v632_v44 = vmax.f32 %v629_v41, 0.0  ;;  %v633_v45 = vmax.f32 %v630_v42, 0.0  ;;  %v634_v49 = vmax.f32 %v631_v43, 0.0  ;;  %1698 = vmatpush3.bf16.msra.mxu0 %v1697_v37 }
 0x2ff   :  { %1699 = vmatprep.subr.bf16.mxu0 %v1775_v3 }
 0x300   :  { %v2158_v50 = vsel %vm2063_vm15, %v632_v44, 0.0  ;;  %v2162_v51 = vsel %vm2069_vm1, %v633_v45, 0.0  ;;  %v2166_v52 = vsel %vm2081_vm5, %v634_v49, 0.0 }
 0x301   :  { %v659_v53 = vrot.slane %v2158_v50, 1  ;;  %v660_v54 = vrot.slane %v2162_v51, 1  ;;  %v662_v57 = vrot.slane %v2166_v52, 1  ;;  %v846_v15 = vrot.slane %v2158_v50, 2 }
 0x302   :  { %v847_v16 = vrot.slane %v2162_v51, 2  ;;  %v849_v18 = vrot.slane %v2166_v52, 2 }
 0x303   :  { %v661_v56 = vsel %vm658_vm7, %v659_v53, %v660_v54  ;;  %v663_v60 = vsel %vm658_vm7, %v660_v54, %v662_v57 }
 0x304   :  { %1495 = vmatmul.mubr.msk.f32.vlgmr.msra.gmra.mrb[4].mxu1 %vm418_vm2, %v661_v56  ;;  %v848_v17 = vsel %vm845_vm8, %v846_v15, %v847_v16  ;;  %v850_v19 = vsel %vm845_vm8, %v847_v16, %v849_v18 }
 0x305   :  { %1665 = vmatpush3.bf16.msra.mxu1 %v1664_v55  ;;  %1497 = vmatprep.mubr.msk.f32.mxu1 %vm1776_vm0, %v1777_v6 }
 0x306   :  { %1666 = vmatprep.subr.bf16.mxu1 %v1775_v3 }
 0x308   :  { %1498 = vmatmul.mubr.msk.f32.gmra.mrb[6].mxu1 %vm418_vm2, %v663_v60 }
 0x309   :  { %1668 = vmatpush3.bf16.msra.mxu1 %v1667_v35  ;;  %1500 = vmatprep.mubr.msk.f32.mxu1 %vm1776_vm0, %v1777_v6 }
 0x30a   :  { %1669 = vmatprep.subr.bf16.mxu1 %v1775_v3 }
 0x30c   :  { %1501 = vmatmul.mubr.msk.f32.gmra.mrb[8].mxu1 %vm418_vm2, %v662_v57 }
 0x30d   :  { %1671 = vmatpush3.bf16.msra.mxu1 %v1670_v61  ;;  %1519 = vmatprep.mubr.msk.f32.mxu1 %vm1776_vm0, %v1777_v6 }
 0x30e   :  { %1672 = vmatprep.subr.bf16.mxu1 %v1775_v3 }
 0x311   :  { %1674 = vmatpush3.bf16.msra.mxu1 %v1673_v0 }
 0x312   :  { %1675 = vmatprep.subr.bf16.mxu1 %v1775_v3 }
 0x314   :  { %1520 = vmatmul.mubr.msk.f32.vlgmr.msra.gmra.mrb[4].mxu1 %vm418_vm2, %v2158_v50 }
 0x315   :  { %1677 = vmatpush3.bf16.msra.mxu1 %v1676_v4  ;;  %1522 = vmatprep.mubr.msk.f32.mxu1 %vm1776_vm0, %v1777_v6 }
 0x316   :  { %1678 = vmatprep.subr.bf16.mxu1 %v1775_v3 }
 0x318   :  { %1523 = vmatmul.mubr.msk.f32.gmra.mrb[6].mxu1 %vm418_vm2, %v2162_v51 }
 0x319   :  { %1680 = vmatpush3.bf16.msra.mxu1 %v1679_v8  ;;  %1525 = vmatprep.mubr.msk.f32.mxu1 %vm1776_vm0, %v1777_v6 }
 0x31a   :  { %1681 = vmatprep.subr.bf16.mxu1 %v1775_v3 }
 0x31c   :  { %1526 = vmatmul.mubr.msk.f32.gmra.mrb[8].mxu1 %vm418_vm2, %v2166_v52 }
 0x31d   :  { %1683 = vmatpush3.bf16.msra.mxu1 %v1682_v11  ;;  %1544 = vmatprep.mubr.msk.f32.mxu1 %vm1776_vm0, %v1777_v6 }
 0x31e   :  { %1684 = vmatprep.subr.bf16.mxu1 %v1775_v3 }
 0x321   :  { %1686 = vmatpush3.bf16.msra.mxu1 %v1685_v14 }
 0x324   :  { %1545 = vmatmul.mubr.msk.f32.vlgmr.msra.gmra.mrb[4].mxu1 %vm418_vm2, %v848_v17  ;;  %v1146_v17 = vld [vmem:[%s2345_s8] sm:$0x1]  ;;  %s1778_s8 = smov [#allocation2]  }
 0x325   :  { %1547 = vmatprep.mubr.msk.f32.mxu1 %vm1776_vm0, %v1777_v6  ;;  %s1185_s7 = sshll.u32 %s1778_s8, 4  ;;  %s1186_s7 = int_to_ptr.vmem [resolvable:$true] %s1185_s7 }
 0x326   :  { %p1756_p1 = scmp.lt.s32.totalorder %s1186_s7, %s1186_s7 }
 0x328   :  { %1548 = vmatmul.mubr.msk.f32.gmra.mrb[6].mxu1 %vm418_vm2, %v850_v19 }
 0x329   :  { %1550 = vmatprep.mubr.msk.f32.mxu1 %vm1776_vm0, %v1777_v6 }
 0x32c   :  { %1551 = vmatmul.mubr.msk.f32.gmra.mrb[8].mxu1 %vm418_vm2, %v849_v18 }
 0x3f7   :  { %v923_v38 = vpop.f32.mrb[4].mxu1 }
 0x3f8   :  { %v1546_v39 = vpop.f32.mrb[5].mxu1  ;;  %v949_v40 = vsel %vm940_vm9, %v923_v38, 0.0 }
 0x3f9   :  { %v952_v44 = vsel %vm418_vm2, %v949_v40, 0.0 }
 0x3fb   :  { %v928_v41 = vpop.f32.mrb[6].mxu1 }
 0x3fc   :  { %v950_v42 = vsel %vm941_vm10, %v928_v41, 0.0  ;;  %v1549_v43 = vpop.f32.mrb[7].mxu1 }
 0x3fd   :  { %v953_v45 = vsel %vm418_vm2, %v950_v42, 0.0 }
 0x3fe   :  { %v954_v46 = vadd.f32 %v953_v45, %v952_v44 }
 0x3ff   :  { %v933_v47 = vpop.f32.mrb[8].mxu1 }
 0x400   :  { %v951_v49 = vsel %vm942_vm11, %v933_v47, 0.0  ;;  %v1552_v50 = vpop.f32.mrb[9].mxu1 }
 0x401   :  { %v956_v51 = vsel %vm955_vm12, %v951_v49, 0.0 }
 0x402   :  { %v957_v52 = vadd.f32 %v956_v51, %v954_v46 }
 0x404   :  { %v958_v53 = vrot.slane %v957_v52, 4 }
 0x406   :  { %v959_v54 = vadd.f32 %v958_v53, %v957_v52 }
 0x408   :  { %v960_v55 = vrot.slane %v959_v54, 2 }
 0x40a   :  { %v961_v25 = vadd.f32 %v960_v55, %v959_v54 }
 0x40c   :  { %v962_v28 = vrot.slane %v961_v25, 1 }
 0x40e   :  { %v963_v56 = vadd.f32 %v962_v28, %v961_v25 }
 0x410   :  { %1570 = vmatmul.mubr.msk.f32.vlgmr.msra.gmra.mrb[6].mxu0 %vm418_vm2, %v963_v56 }
 0x411   :  { %1701 = vmatpush3.bf16.msra.mxu0 %v1688_v24  ;;  %1588 = vmatprep.mubr.msk.f32.mxu0 %vm1776_vm0, %v1777_v6  ;;  %v1253_v24 = vld [vmem:[%s2346_s9] ss:$0 sm:$0xff]  ;;  %vm1177_vm0 = vcmask 523266   ;;  %s1751_s9 = scalar_lea.vmem %s1186_s7, 256 }
 0x412   :  { %1702 = vmatprep.subr.bf16.mxu0 %v1775_v3  ;;  %p1752_p0 = scmp.ne.s32.totalorder %s1186_s7, %s1751_s9  ;;  %p1757_p2 = scmp.lt.s32.totalorder %s1751_s9, %s1751_s9 }
 0x414   :  { %p1758_p3 = por %p1757_p2, %p1756_p1 }
 0x415   :  { %1704 = vmatpush3.bf16.msra.mxu0 %v1691_v30 }
 0x416   :  { %1705 = vmatprep.subr.bf16.mxu0 %v1775_v3  ;;  %p1759_p4 = pnand %p1758_p3, %p1752_p0 }
 0x419   :  { %1707 = vmatpush3.bf16.msra.mxu0 %v1694_v33 }
 0x41a   :  { %1708 = vmatprep.subr.bf16.mxu0 %v1775_v3 }
 0x41d   :  { %1710 = vmatpush3.bf16.msra.mxu0 %v1697_v37 }
 0x4e3   :  { %v1041_v57 = vpop.f32.mrb[6].mxu0 }
 0x4e4   :  { %v1045_v35 = vmul.f32 0.0078125, %v1041_v57  ;;  %v1571_v58 = vpop.f32.mrb[7].mxu0 }
 0x4e6   :  { %v1049_v59 = vrot.slane %v1045_v35, %v2100_v48 }
 0x4e8   :  { %v1050_v60 = vsub.f32 %v923_v38, %v1049_v59  ;;  %v1051_v61 = vsub.f32 %v928_v41, %v1049_v59  ;;  %v1052_v62 = vsub.f32 %v933_v47, %v1049_v59 }
 0x4ea   :  { %v1053_v6 = vsel %vm940_vm9, %v1050_v60, 0.0  ;;  %v1054_v63 = vsel %vm941_vm10, %v1051_v61, 0.0  ;;  %v1055_v0 = vsel %vm942_vm11, %v1052_v62, 0.0 }
 0x4eb   :  { %v1056_v1 = vmul.f32 %v1053_v6, %v1053_v6  ;;  %v1057_v3 = vmul.f32 %v1054_v63, %v1054_v63  ;;  %v1058_v2 = vmul.f32 %v1055_v0, %v1055_v0 }
 0x4ed   :  { %v1059_v4 = vsel %vm418_vm2, %v1056_v1, 0.0  ;;  %v1060_v5 = vsel %vm418_vm2, %v1057_v3, 0.0  ;;  %v1062_v8 = vsel %vm955_vm12, %v1058_v2, 0.0 }
 0x4ee   :  { %v1061_v7 = vadd.f32 %v1060_v5, %v1059_v4 }
 0x4f0   :  { %v1063_v9 = vadd.f32 %v1062_v8, %v1061_v7 }
 0x4f2   :  { %v1064_v10 = vrot.slane %v1063_v9, 4 }
 0x4f4   :  { %v1065_v21 = vadd.f32 %v1064_v10, %v1063_v9 }
 0x4f6   :  { %v1066_v11 = vrot.slane %v1065_v21, 2 }
 0x4f8   :  { %v1067_v12 = vadd.f32 %v1066_v11, %v1065_v21 }
 0x4fa   :  { %v1068_v22 = vrot.slane %v1067_v12, 1 }
 0x4fc   :  { %v1069_v13 = vadd.f32 %v1068_v22, %v1067_v12 }
 0x4fe   :  { %1589 = vmatmul.mubr.msk.f32.vlgmr.msra.gmra.mrb[8].mxu0 %vm418_vm2, %v1069_v13 }
 0x5d1   :  { %v1139_v26 = vpop.f32.mrb[8].mxu0 }
 0x5d2   :  { %v1143_v14 = vmul.f32 0.0078125, %v1139_v26  ;;  %v1590_v15 = vpop.f32.mrb[9].mxu0 }
 0x5d4   :  { %v1144_v16 = vadd.f32 1e-05, %v1143_v14 }
 0x5d6   :  { %1749 = vrsqrt.f32 %v1144_v16 }
 0x5e0   :  { %v1750_v18 = vpop.eup %1749 }
 0x5e1   :  { %v1147_v19 = vmul.f32 %v1750_v18, %v1146_v17 }
 0x5e3   :  { %v1151_v23 = vrot.slane %v1147_v19, %v2100_v48 }
 0x5e5   :  { %v1152_v27 = vmul.f32 %v1151_v23, %v1050_v60  ;;  %v1153_v29 = vmul.f32 %v1151_v23, %v1051_v61  ;;  %v1154_v30 = vmul.f32 %v1151_v23, %v1052_v62 }
 0x5e7   :  { %v1162_v33 = vadd.f32 %v1253_v24, %v1152_v27  ;;  %v1163_v34 = vadd.f32 %v1253_v24, %v1153_v29  ;;  %v1164_v36 = vadd.f32 %v1253_v24, %v1154_v30 }
 0x5e9   :  { %v1166_v37 = vadd.f32 %v1165_v32, %v1162_v33  ;;  %v1173_v38 = vadd.f32 %v1171_v31, %v1163_v34  ;;  %v1174_v48 = vadd.f32 %v1171_v31, %v1164_v36 }
 0x5eb   :  { %v1167_v39 = vmax.f32 %v1166_v37, 0.0  ;;  %v1175_v40 = vmax.f32 %v1173_v38, 0.0  ;;  %v1176_v41 = vmax.f32 %v1174_v48, 0.0 }
 0x5ed   :  { %1168 = vst.msk [vmem:[#allocation2] sm:$0xff] %vm418_vm2, %v1167_v39 }
 0x5ee   :  { %1178 = vst.msk [vmem:[#allocation2 + $0x6] sm:$0xfc] %vm1177_vm0, %v1175_v40 }
 0x5ef   :  { %1179 = vst.msk [vmem:[#allocation2 + $0xe] sm:$0x3] %vm955_vm12, %v1176_v41 }
 0x5f0   :  { %1762 = shalt.err (!%p1759_p4)
}
 0x5f1   :  { %s1763_s24 = scalar_lea.hbm %s2348_s11, 256 }
 0x5f2   :  { %p1764_p5 = scmp.ne.s32.totalorder %s2348_s11, %s1763_s24  ;;  %p1767_p6 = scmp.lt.u32.totalorder %s1763_s24, %s2348_s11 }
 0x5f4   :  { %p1769_p7 = pnand %p1767_p6, %p1764_p5 }
 0x5f6   :  { %1772 = shalt.err (!%p1769_p7)
}
 0x5f7   :  { %s1779_s2 = smov 128   ;;  %s1780_s28 = smov 8  }
 0x5f8   :  { %1191 = dma.vmem_to_hbm [thread:$0]  %s1186_s7, 256, %s2348_s11, [#allocation3], %s1779_s2, %s1779_s2, %s1780_s28  }
 0x5f9   :  { %1773 = dma.done.wait [#allocation3], 256  }
 0x5fa   :  { %1774 = vsyncadd [#allocation3], 4294967040 }
 0x5fb   :  { %1195 = vsyncpa [#allocation3], 1 }

</bundles_post_ra>
